<compile_context>
chip_gen: v5e
topology: v5e:2x2
jax: 0.10.0
libtpu: 0.0.40
codegen_flags: <defaults>
</compile_context>

<pallas_src>
import functools

import jax
import jax.numpy as jnp
from jax.experimental import pallas as pl
from jax.experimental.pallas import tpu as pltpu

# Padded (lane-friendly) hidden / output sizes.
H1_PAD = 256    # 250 -> 256
H2_PAD = 128    # 100 -> 128
OUT_PAD = 128   # outputs -> 128


def split_driver_kernel(mu_ref, lv_ref, eps_ref, w1_ref, w2_ref, w3_ref,
                        bias_ref, out_ref):
    """mu/lv/eps: (bt, latent_dim) f32.  w*: padded bf16 weights.
       bias_ref: (8, H1_PAD) f32, rows 0/1/2 = b1/b2/b3 (zero padded).
       out_ref : (bt, OUT_PAD) bf16 (lane-dense, unmasked store)."""
    # Reparameterization in f32 (exp lands on the EUP slot, essentially free).
    z = eps_ref[...] * jnp.exp(0.5 * lv_ref[...]) + mu_ref[...]

    # Layer 1: (bt, latent) x (latent, 256) on the MXU, f32 accumulation.
    h1 = jnp.dot(z.astype(jnp.bfloat16), w1_ref[...],
                 preferred_element_type=jnp.float32)
    h1 = jnp.maximum(h1 + bias_ref[0:1, :], 0.0)

    # Layer 2: (bt, 256) x (256, 128).
    h2 = jnp.dot(h1.astype(jnp.bfloat16), w2_ref[...],
                 preferred_element_type=jnp.float32)
    h2 = jnp.maximum(h2 + bias_ref[1:2, :H2_PAD], 0.0)

    # Layer 3: (bt, 128) x (128, 128), tanh output.
    y = jnp.dot(h2.astype(jnp.bfloat16), w3_ref[...],
                preferred_element_type=jnp.float32)
    out_ref[...] = jnp.tanh(y + bias_ref[2:3, :OUT_PAD]).astype(out_ref.dtype)


def _round_up(x, m):
    return ((x + m - 1) // m) * m


def _pad_batch(b):
    """Returns (padded_batch, batch_tile)."""
    if b <= 128:
        bp = _round_up(b, 16)            # bf16 sublane packing of the LHS cast
        # Split into 2 grid steps when possible so the "parallel" axis can
        # shard across both v7x TensorCores (no effect at tiny batches).
        if bp >= 32 and (bp // 2) % 16 == 0:
            return bp, bp // 2
        return bp, bp
    # Large batch: bigger tiles amortize per-step overhead & MXU fill/drain.
    bt = 512 if b >= 2048 else 256
    return _round_up(b, bt), bt


def prepare_params(params, latent_dim, outputs):
    """One-time preprocessing: pad weights to lane-friendly bf16 tiles and pack
    the three biases into a single small f32 slab.  Call ONCE and reuse."""
    w1, b1 = params["w1"], params["b1"]
    w2, b2 = params["w2"], params["b2"]
    w3, b3 = params["w3"], params["b3"]
    h1, h2 = w1.shape[1], w2.shape[1]    # 250, 100

    # Guard against future width changes silently overflowing the padding.
    assert w1.shape[0] == latent_dim
    assert h1 <= H1_PAD and h2 <= H2_PAD and outputs <= OUT_PAD

    w1p = jnp.zeros((latent_dim, H1_PAD), jnp.float32).at[:, :h1].set(w1)
    w2p = jnp.zeros((H1_PAD, H2_PAD), jnp.float32).at[:h1, :h2].set(w2)
    w3p = jnp.zeros((H2_PAD, OUT_PAD), jnp.float32).at[:h2, :outputs].set(w3)

    bias = jnp.zeros((8, H1_PAD), jnp.float32)
    bias = bias.at[0, :h1].set(b1).at[1, :h2].set(b2).at[2, :outputs].set(b3)

    return {"w1": w1p.astype(jnp.bfloat16),
            "w2": w2p.astype(jnp.bfloat16),
            "w3": w3p.astype(jnp.bfloat16),
            "bias": bias}


@functools.partial(jax.jit, static_argnames=("latent_dim", "outputs"))
def split_driver_forward(mu, log_var, eps, prepared, *, latent_dim, outputs):
    """SplitDriver forward in one Pallas kernel.  Returns [B, outputs] f32.

    `prepared` is the output of prepare_params() (computed once, reused)."""
    b = mu.shape[0]
    b_pad, bt = _pad_batch(b)
    if b_pad != b:
        pad = ((0, b_pad - b), (0, 0))
        mu = jnp.pad(mu, pad)
        log_var = jnp.pad(log_var, pad)
        eps = jnp.pad(eps, pad)

    flops = 2 * b_pad * (latent_dim * H1_PAD + H1_PAD * H2_PAD + H2_PAD * OUT_PAD)
    bytes_accessed = (3 * b_pad * latent_dim * 4
                      + (prepared["w1"].size + prepared["w2"].size
                         + prepared["w3"].size) * 2
                      + prepared["bias"].size * 4
                      + b_pad * OUT_PAD * 2)
    cost = pl.CostEstimate(flops=flops,
                           transcendentals=b_pad * (latent_dim + OUT_PAD),
                           bytes_accessed=bytes_accessed)

    # Weights/bias have constant index_maps -> single-buffered, fetched once.
    w_mode = pl.Buffered(1)

    out = pl.pallas_call(
        split_driver_kernel,
        out_shape=jax.ShapeDtypeStruct((b_pad, OUT_PAD), jnp.bfloat16),
        grid=(b_pad // bt,),
        in_specs=[
            pl.BlockSpec((bt, latent_dim), lambda i: (i, 0)),
            pl.BlockSpec((bt, latent_dim), lambda i: (i, 0)),
            pl.BlockSpec((bt, latent_dim), lambda i: (i, 0)),
            pl.BlockSpec((latent_dim, H1_PAD), lambda i: (0, 0),
                         pipeline_mode=w_mode),
            pl.BlockSpec((H1_PAD, H2_PAD), lambda i: (0, 0),
                         pipeline_mode=w_mode),
            pl.BlockSpec((H2_PAD, OUT_PAD), lambda i: (0, 0),
                         pipeline_mode=w_mode),
            pl.BlockSpec((8, H1_PAD), lambda i: (0, 0),
                         pipeline_mode=w_mode),
        ],
        out_specs=pl.BlockSpec((bt, OUT_PAD), lambda i: (i, 0)),
        compiler_params=pltpu.CompilerParams(
            dimension_semantics=("parallel",)),
        cost_estimate=cost,
    )(mu, log_var, eps, prepared["w1"], prepared["w2"], prepared["w3"],
      prepared["bias"])

    return out[:b, :outputs].astype(jnp.float32)


def init_params(key, latent_dim, outputs=2):
    """Deterministic parameter init (shapes from SplitDriver.__init__)."""
    ks = jax.random.split(key, 6)

    def lin(kw, kb, fan_in, fan_out):
        bound = 1.0 / (fan_in ** 0.5)
        w = jax.random.uniform(kw, (fan_in, fan_out), jnp.float32, -bound, bound)
        b = jax.random.uniform(kb, (fan_out,), jnp.float32, -bound, bound)
        return w, b

    w1, b1 = lin(ks[0], ks[1], latent_dim, 250)
    w2, b2 = lin(ks[2], ks[3], 250, 100)
    w3, b3 = lin(ks[4], ks[5], 100, outputs)
    return {"w1": w1, "b1": b1, "w2": w2, "b2": b2, "w3": w3, "b3": b3}


if __name__ == "__main__":
    latent_dim = 32
    outputs = 2
    batch = 8
    no_var = False

    key = jax.random.PRNGKey(0)
    k_mu, k_lv, k_eps, k_params = jax.random.split(key, 4)

    mu = jax.random.normal(k_mu, (batch, latent_dim), jnp.float32)
    log_var = jax.random.normal(k_lv, (batch, latent_dim), jnp.float32) * 0.1
    # eps ~ N(0,1); zeros reproduce the no_var path (z = mu).
    # TODO(synk): eps could be drawn in-kernel via pltpu.prng_seed/prng_random_bits
    # (Box-Muller) to drop this operand; kept explicit to preserve the
    # deterministic test/no_var path.
    eps = (jnp.zeros((batch, latent_dim), jnp.float32) if no_var
           else jax.random.normal(k_eps, (batch, latent_dim), jnp.float32))

    params = init_params(k_params, latent_dim, outputs)

    # One-time weight preprocessing (hoisted out of the per-call hot path).
    prepared = prepare_params(params, latent_dim, outputs)
    prepared = jax.tree_util.tree_map(jax.block_until_ready, prepared)

    out = split_driver_forward(mu, log_var, eps, prepared,
                               latent_dim=latent_dim, outputs=outputs)
    out = jax.block_until_ready(out)
    assert out.shape == (batch, outputs)

    # (1) Semantic reference: original f32 SplitDriver math (loose tolerance,
    #     since the kernel feeds bf16 operands into the MXU and stores bf16).
    z = eps * jnp.exp(0.5 * log_var) + mu
    h1 = jnp.maximum(z @ params["w1"] + params["b1"], 0.0)
    h2 = jnp.maximum(h1 @ params["w2"] + params["b2"], 0.0)
    ref_f32 = jnp.tanh(h2 @ params["w3"] + params["b3"])
    assert jnp.allclose(out, ref_f32, atol=5e-2), \
        float(jnp.abs(out - ref_f32).max())

    # (2) Tight reference: identical bf16-weight / bf16-output math as the kernel.
    zb = (eps * jnp.exp(0.5 * log_var) + mu).astype(jnp.bfloat16)
    h1r = jnp.maximum(
        jnp.dot(zb, prepared["w1"], preferred_element_type=jnp.float32)
        + prepared["bias"][0:1, :], 0.0)
    h2r = jnp.maximum(
        jnp.dot(h1r.astype(jnp.bfloat16), prepared["w2"],
                preferred_element_type=jnp.float32)
        + prepared["bias"][1:2, :H2_PAD], 0.0)
    yr = jnp.tanh(
        jnp.dot(h2r.astype(jnp.bfloat16), prepared["w3"],
                preferred_element_type=jnp.float32)
        + prepared["bias"][2:3, :OUT_PAD])
    ref_bf16 = yr.astype(jnp.bfloat16).astype(jnp.float32)[:, :outputs]
    assert jnp.allclose(out, ref_bf16, atol=1e-2, rtol=1e-2), \
        float(jnp.abs(out - ref_bf16).max())

    print("KERNEL_OK")
</pallas_src>

<mosaic_0001>
module attributes {stable_mosaic.version = 11 : i64} {
  func.func @split_driver_kernel(%arg0: i32, %arg1: memref<16x32xf32, #tpu.memory_space<vmem>>, %arg2: memref<16x32xf32, #tpu.memory_space<vmem>>, %arg3: memref<16x32xf32, #tpu.memory_space<vmem>>, %arg4: memref<32x256xbf16, #tpu.memory_space<vmem>>, %arg5: memref<256x128xbf16, #tpu.memory_space<vmem>>, %arg6: memref<128x128xbf16, #tpu.memory_space<vmem>>, %arg7: memref<8x256xf32, #tpu.memory_space<vmem>>, %arg8: memref<16x128xbf16, #tpu.memory_space<vmem>>) attributes {dimension_semantics = [#tpu.dimension_semantics<parallel>], iteration_bounds = array<i64: 1>, scalar_prefetch = 0 : i64, scratch_operands = 0 : i64, tpu.core_type = #tpu.core_type<tc>, window_params = [{transform_indices = @transform_0, window_bounds = array<i64: 16, 32>}, {transform_indices = @transform_1, window_bounds = array<i64: 16, 32>}, {transform_indices = @transform_2, window_bounds = array<i64: 16, 32>}, {pipeline_mode = #tpu.pipeline_mode<synchronous>, transform_indices = @transform_3, window_bounds = array<i64: 32, 256>}, {pipeline_mode = #tpu.pipeline_mode<synchronous>, transform_indices = @transform_4, window_bounds = array<i64: 256, 128>}, {pipeline_mode = #tpu.pipeline_mode<synchronous>, transform_indices = @transform_5, window_bounds = array<i64: 128, 128>}, {pipeline_mode = #tpu.pipeline_mode<synchronous>, transform_indices = @transform_6, window_bounds = array<i64: 8, 256>}, {transform_indices = @transform_7, window_bounds = array<i64: 16, 128>}]} {
    %c0 = arith.constant 0 : index
    %c0_0 = arith.constant 0 : index
    %0 = vector.load %arg3[%c0, %c0_0] : memref<16x32xf32, #tpu.memory_space<vmem>>, vector<16x32xf32>
    %c0_1 = arith.constant 0 : index
    %c0_2 = arith.constant 0 : index
    %1 = vector.load %arg2[%c0_1, %c0_2] : memref<16x32xf32, #tpu.memory_space<vmem>>, vector<16x32xf32>
    %cst = arith.constant 5.000000e-01 : f32
    %2 = vector.broadcast %cst : f32 to vector<16x32xf32>
    %3 = arith.mulf %2, %1 : vector<16x32xf32>
    %4 = math.exp %3 : vector<16x32xf32>
    %5 = arith.mulf %0, %4 : vector<16x32xf32>
    %c0_3 = arith.constant 0 : index
    %c0_4 = arith.constant 0 : index
    %6 = vector.load %arg1[%c0_3, %c0_4] : memref<16x32xf32, #tpu.memory_space<vmem>>, vector<16x32xf32>
    %7 = arith.addf %5, %6 : vector<16x32xf32>
    %8 = arith.truncf %7 : vector<16x32xf32> to vector<16x32xbf16>
    %c0_5 = arith.constant 0 : index
    %c0_6 = arith.constant 0 : index
    %9 = vector.load %arg4[%c0_5, %c0_6] : memref<32x256xbf16, #tpu.memory_space<vmem>>, vector<32x256xbf16>
    %cst_7 = arith.constant dense<0.000000e+00> : vector<16x256xf32>
    %10 = tpu.matmul %8, %9, %cst_7 {dimension_numbers = #tpu.dot_dimension_numbers<[1], [0], [0], [1], [0, 0, 1, 1], [], []>} : vector<16x32xbf16>, vector<32x256xbf16>, vector<16x256xf32> -> vector<16x256xf32>
    %c0_8 = arith.constant 0 : index
    %c0_9 = arith.constant 0 : index
    %11 = vector.load %arg7[%c0_8, %c0_9] : memref<8x256xf32, #tpu.memory_space<vmem>>, vector<1x256xf32>
    %12 = vector.broadcast %11 : vector<1x256xf32> to vector<16x256xf32>
    %13 = arith.addf %10, %12 : vector<16x256xf32>
    %cst_10 = arith.constant 0.000000e+00 : f32
    %14 = vector.broadcast %cst_10 : f32 to vector<16x256xf32>
    %15 = arith.maximumf %13, %14 : vector<16x256xf32>
    %16 = arith.truncf %15 : vector<16x256xf32> to vector<16x256xbf16>
    %c0_11 = arith.constant 0 : index
    %c0_12 = arith.constant 0 : index
    %17 = vector.load %arg5[%c0_11, %c0_12] : memref<256x128xbf16, #tpu.memory_space<vmem>>, vector<256x128xbf16>
    %cst_13 = arith.constant dense<0.000000e+00> : vector<16x128xf32>
    %18 = tpu.matmul %16, %17, %cst_13 {dimension_numbers = #tpu.dot_dimension_numbers<[1], [0], [0], [1], [0, 0, 1, 1], [], []>} : vector<16x256xbf16>, vector<256x128xbf16>, vector<16x128xf32> -> vector<16x128xf32>
    %c1 = arith.constant 1 : index
    %c0_14 = arith.constant 0 : index
    %19 = vector.load %arg7[%c1, %c0_14] : memref<8x256xf32, #tpu.memory_space<vmem>>, vector<1x128xf32>
    %20 = vector.broadcast %19 : vector<1x128xf32> to vector<16x128xf32>
    %21 = arith.addf %18, %20 : vector<16x128xf32>
    %cst_15 = arith.constant 0.000000e+00 : f32
    %22 = vector.broadcast %cst_15 : f32 to vector<16x128xf32>
    %23 = arith.maximumf %21, %22 : vector<16x128xf32>
    %24 = arith.truncf %23 : vector<16x128xf32> to vector<16x128xbf16>
    %c0_16 = arith.constant 0 : index
    %c0_17 = arith.constant 0 : index
    %25 = vector.load %arg6[%c0_16, %c0_17] : memref<128x128xbf16, #tpu.memory_space<vmem>>, vector<128x128xbf16>
    %cst_18 = arith.constant dense<0.000000e+00> : vector<16x128xf32>
    %26 = tpu.matmul %24, %25, %cst_18 {dimension_numbers = #tpu.dot_dimension_numbers<[1], [0], [0], [1], [0, 0, 1, 1], [], []>} : vector<16x128xbf16>, vector<128x128xbf16>, vector<16x128xf32> -> vector<16x128xf32>
    %c2 = arith.constant 2 : index
    %c0_19 = arith.constant 0 : index
    %27 = vector.load %arg7[%c2, %c0_19] : memref<8x256xf32, #tpu.memory_space<vmem>>, vector<1x128xf32>
    %28 = vector.broadcast %27 : vector<1x128xf32> to vector<16x128xf32>
    %29 = arith.addf %26, %28 : vector<16x128xf32>
    %30 = math.tanh %29 : vector<16x128xf32>
    %31 = arith.truncf %30 : vector<16x128xf32> to vector<16x128xbf16>
    %c0_20 = arith.constant 0 : index
    %c0_21 = arith.constant 0 : index
    %32 = vector.load %arg8[%c0_20, %c0_21] : memref<16x128xbf16, #tpu.memory_space<vmem>>, vector<16x128xbf16>
    tpu.vector_store %arg8[%c0_20, %c0_21], %31 {strides = array<i32>} : memref<16x128xbf16, #tpu.memory_space<vmem>>, vector<16x128xbf16>,
    return
  }
  func.func @transform_0(%arg0: i32) -> (i32, i32) {
    %c0_i32 = arith.constant 0 : i32
    %c0_i32_0 = arith.constant 0 : i32
    return %arg0, %c0_i32 : i32, i32
  }
  func.func @transform_1(%arg0: i32) -> (i32, i32) {
    %c0_i32 = arith.constant 0 : i32
    %c0_i32_0 = arith.constant 0 : i32
    return %arg0, %c0_i32 : i32, i32
  }
  func.func @transform_2(%arg0: i32) -> (i32, i32) {
    %c0_i32 = arith.constant 0 : i32
    %c0_i32_0 = arith.constant 0 : i32
    return %arg0, %c0_i32 : i32, i32
  }
  func.func @transform_3(%arg0: i32) -> (i32, i32) {
    %c0_i32 = arith.constant 0 : i32
    %c0_i32_0 = arith.constant 0 : i32
    %c0_i32_1 = arith.constant 0 : i32
    return %c0_i32, %c0_i32_0 : i32, i32
  }
  func.func @transform_4(%arg0: i32) -> (i32, i32) {
    %c0_i32 = arith.constant 0 : i32
    %c0_i32_0 = arith.constant 0 : i32
    %c0_i32_1 = arith.constant 0 : i32
    return %c0_i32, %c0_i32_0 : i32, i32
  }
  func.func @transform_5(%arg0: i32) -> (i32, i32) {
    %c0_i32 = arith.constant 0 : i32
    %c0_i32_0 = arith.constant 0 : i32
    %c0_i32_1 = arith.constant 0 : i32
    return %c0_i32, %c0_i32_0 : i32, i32
  }
  func.func @transform_6(%arg0: i32) -> (i32, i32) {
    %c0_i32 = arith.constant 0 : i32
    %c0_i32_0 = arith.constant 0 : i32
    %c0_i32_1 = arith.constant 0 : i32
    return %c0_i32, %c0_i32_0 : i32, i32
  }
  func.func @transform_7(%arg0: i32) -> (i32, i32) {
    %c0_i32 = arith.constant 0 : i32
    %c0_i32_0 = arith.constant 0 : i32
    return %arg0, %c0_i32 : i32, i32
  }
}

</mosaic_0001>

<bundles_post_ra>
// kernel: split_driver_forward.1
= control target key start
LH: loop header
LB: loop body
LE: loop exit
PB: predicated region body
PF: predicated region fallthrough
CT: control target
= control target key end

     0   :  { %12 = vsyncpa [#allocation3], 0  ;;  %s714_s0 = inlined_call_operand.vmem [shape: f32[16,32], index: 0, kind: input, shape index: {}]   ;;  %s715_s1 = inlined_call_operand.vmem [shape: f32[16,32], index: 1, kind: input, shape index: {}]   ;;  %s716_s2 = inlined_call_operand.vmem [shape: f32[16,32], index: 2, kind: input, shape index: {}]   ;;  %s717_s3 = inlined_call_operand.hbm [shape: bf16[32,256], index: 3, kind: input, shape index: {}]   ;;  %s718_s4 = inlined_call_operand.hbm [shape: bf16[256,128], index: 4, kind: input, shape index: {}]   ;;  %s719_s5 = inlined_call_operand.vmem [shape: bf16[128,128], index: 5, kind: input, shape index: {}]   ;;  %s720_s6 = inlined_call_operand.vmem [shape: f32[8,256], index: 6, kind: input, shape index: {}]   ;;  %s721_s7 = inlined_call_operand.vmem [shape: bf16[16,128], index: 7, kind: output, shape index: {}]  }
   0x1   :  { %s24_s26 = sshll.u32 %s717_s3, 4  ;;  %s25_s26 = int_to_ptr.hbm [resolvable:$true] %s24_s26 }
   0x2   :  { %13 = vsyncpa [#allocation5], 0  ;;  %s608_s27 = smov [#allocation2]   ;;  %s37_s8 = sshll.u32 %s718_s4, 4  ;;  %s38_s8 = int_to_ptr.hbm [resolvable:$true] %s37_s8 }
   0x3   :  { %s26_s28 = sshll.u32 %s608_s27, 4  ;;  %s609_s9 = smov 128   ;;  %s27_s28 = int_to_ptr.vmem [resolvable:$true] %s26_s28 }
   0x4   :  { %s610_s10 = smov 8   ;;  %s611_s11 = smov [#allocation4]  }
   0x5   :  { %32 = dma.hbm_to_vmem [thread:$0]  %s25_s26, 512, %s27_s28, [#allocation3], %s609_s9, %s609_s9, %s610_s10  }
   0x6   :  { %s39_s12 = sshll.u32 %s611_s11, 4  ;;  %s612_s13 = smov 64   ;;  %s40_s12 = int_to_ptr.vmem [resolvable:$true] %s39_s12 }
   0x7   :  { %s613_s14 = smov 4  }
   0x8   :  { %45 = dma.hbm_to_vmem [thread:$0]  %s38_s8, 2048, %s40_s12, [#allocation5], %s612_s13, %s612_s13, %s613_s14  }
   0x9   :  { %604 = dma.done.wait [#allocation3], 512  }
   0xa   :  { %605 = vsyncadd [#allocation3], 4294966784 }
   0xb   :  { %606 = dma.done.wait [#allocation5], 2048  }
   0xc   :  { %607 = vsyncadd [#allocation5], 4294965248  ;;  %v405_v0 = vld [vmem:[#allocation2 + $0x10] sm:$0xf]  ;;  %v512_v1 = vld [vmem:[#allocation2 + $0x14] sm:$0xf0] }
   0xd   :  { %v397_v2 = vld [vmem:[#allocation2] sm:$0xf]  ;;  %v406_v3 = vor.u32 %v512_v1, %v405_v0  ;;  %v510_v4 = vld [vmem:[#allocation2 + $0x4] sm:$0xf0]  ;;  %v511_v10 = vld [vmem:[#allocation2 + $0x14] sm:$0xf] }
   0xe   :  { %v61_v5 = vld [vmem:[%s715_s1] sm:$0xff]  ;;  %v62_v6 = vld [vmem:[%s715_s1 + $0x8] sm:$0xff]  ;;  %v398_v7 = vor.u32 %v510_v4, %v397_v2  ;;  %v407_v11 = vld [vmem:[#allocation2 + $0x18] sm:$0xf0]  ;;  %vm106_vm0 = vcmask 261120  }
   0xf   :  { %116 = vmatpush.bf16.msra.mxu1 %v406_v3  ;;  %v63_v8 = vmul.f32 0.5, %v61_v5  ;;  %v64_v9 = vmul.f32 0.5, %v62_v6  ;;  %v509_v12 = vld [vmem:[#allocation2 + $0x4] sm:$0xf]  ;;  %v399_v13 = vld [vmem:[#allocation2 + $0x8] sm:$0xf0]  ;;  %v410_v16 = vor.u32 %v511_v10, %v407_v11 }
  0x10   :  { %v520_v17 = vld [vmem:[#allocation4 + $0x38] sm:$0xff]  ;;  %v519_v18 = vld [vmem:[#allocation4 + $0x30] sm:$0xff]  ;;  %v402_v19 = vor.u32 %v509_v12, %v399_v13  ;;  %v59_v20 = vld [vmem:[%s716_s2] sm:$0xff] }
  0x11   :  { %v65_v14 = vmul.f32 1.442695, %v63_v8  ;;  %v67_v15 = vmul.f32 1.442695, %v64_v9  ;;  %273 = vmatpush.bf16.msra.mxu2 %v520_v17  ;;  %v518_v21 = vld [vmem:[#allocation4 + $0x28] sm:$0xff]  ;;  %v71_v24 = vld [vmem:[%s714_s0] sm:$0xff] }
  0x12   :  { %v60_v22 = vld [vmem:[%s716_s2 + $0x8] sm:$0xff]  ;;  %v517_v29 = vld [vmem:[#allocation4 + $0x20] sm:$0xff]  ;;  %v516_v33 = vld [vmem:[#allocation4 + $0x18] sm:$0xff] }
  0x13   :  { %117 = vmatpush.bf16.msra.mxu1 %v398_v7  ;;  %548 = vpow2.f32 %v65_v14  ;;  %v72_v27 = vld [vmem:[%s714_s0 + $0x8] sm:$0xff]  ;;  %v528_v34 = vld [vmem:[#allocation4 + $0x78] sm:$0xff]  ;;  %v515_v35 = vld [vmem:[#allocation4 + $0x10] sm:$0xff] }
  0x14   :  { %550 = vpow2.f32 %v67_v15  ;;  %287 = vmatpush.bf16.msra.mxu3 %v528_v34  ;;  %v527_v36 = vld [vmem:[#allocation4 + $0x70] sm:$0xff]  ;;  %v514_v37 = vld [vmem:[#allocation4 + $0x8] sm:$0xff]  ;;  %v513_v39 = vld [vmem:[#allocation4] sm:$0xff] }
  0x15   :  { %274 = vmatpush.bf16.msra.mxu2 %v519_v18  ;;  %v526_v38 = vld [vmem:[#allocation4 + $0x68] sm:$0xff]  ;;  %v525_v40 = vld [vmem:[#allocation4 + $0x60] sm:$0xff]  ;;  %v524_v41 = vld [vmem:[#allocation4 + $0x58] sm:$0xff] }
  0x16   :  { %v523_v42 = vld [vmem:[#allocation4 + $0x50] sm:$0xff]  ;;  %v522_v43 = vld [vmem:[#allocation4 + $0x48] sm:$0xff]  ;;  %v521_v44 = vld [vmem:[#allocation4 + $0x40] sm:$0xff] }
  0x17   :  { %130 = vmatpush.bf16.msrb.mxu1 %v410_v16  ;;  %v80_v45 = vld [vmem:[%s720_s6] ss:$8 sm:$0x3]  ;;  %v536_v62 = vld [vmem:[%s719_s5 + $0x38] sm:$0xff]  ;;  %v535_v63 = vld [vmem:[%s719_s5 + $0x30] sm:$0xff] }
  0x18   :  { %288 = vmatpush.bf16.msra.mxu3 %v527_v36  ;;  %v82_v47 = vperm.slane %v80_v45, 0  ;;  %v83_v55 = vperm.slane %v80_v45, 1  ;;  %369 = vmatpush.bf16.msra.mxu0 %v536_v62  ;;  %v534_v0 = vld [vmem:[%s719_s5 + $0x28] sm:$0xff]  ;;  %v533_v1 = vld [vmem:[%s719_s5 + $0x20] sm:$0xff]  ;;  %v532_v2 = vld [vmem:[%s719_s5 + $0x18] sm:$0xff] }
  0x19   :  { %v549_v23 = vpop.eup %548  ;;  %275 = vmatpush.bf16.msra.mxu2 %v518_v21  ;;  %v531_v3 = vld [vmem:[%s719_s5 + $0x10] sm:$0xff]  ;;  %v530_v4 = vld [vmem:[%s719_s5 + $0x8] sm:$0xff]  ;;  %v529_v5 = vld [vmem:[%s719_s5] sm:$0xff] }
  0x1a   :  { %v551_v25 = vpop.eup %550  ;;  %v69_v26 = vmul.f32 %v549_v23, %v59_v20  ;;  %v176_v8 = vld [vmem:[%s720_s6 + $0x1] ss:$0 sm:$0xff] }
  0x1b   :  { %131 = vmatpush.bf16.msrb.mxu1 %v402_v19  ;;  %v70_v28 = vmul.f32 %v551_v25, %v60_v22  ;;  %v320_v19 = vld [vmem:[%s720_s6 + $0x2] ss:$0 sm:$0xff] }
  0x1c   :  { %v73_v30 = vadd.f32 %v71_v24, %v69_v26  ;;  %289 = vmatpush.bf16.msra.mxu3 %v526_v38  ;;  %370 = vmatpush.bf16.msra.mxu0 %v535_v63 }
  0x1d   :  { %v74_v31 = vadd.f32 %v72_v27, %v70_v28  ;;  %276 = vmatpush.bf16.msra.mxu2 %v517_v29 }
  0x1f   :  { %v75_v32 = vpack.c.bf16 %v74_v31, %v73_v30 }
  0x20   :  { %290 = vmatpush.bf16.msra.mxu3 %v525_v40  ;;  %371 = vmatpush.bf16.msra.mxu0 %v534_v0 }
  0x21   :  { %411 = vmatmul.msk.bf16.vlgmr.msra.gmra.mxu1 %vm106_vm0, %v75_v32  ;;  %277 = vmatpush.bf16.msra.mxu2 %v516_v33 }
  0x24   :  { %291 = vmatpush.bf16.msra.mxu3 %v524_v41  ;;  %372 = vmatpush.bf16.msra.mxu0 %v533_v1 }
  0x25   :  { %278 = vmatpush.bf16.msra.mxu2 %v515_v35 }
  0x28   :  { %292 = vmatpush.bf16.msra.mxu3 %v523_v42  ;;  %373 = vmatpush.bf16.msra.mxu0 %v532_v2 }
  0x29   :  { %279 = vmatpush.bf16.msra.mxu2 %v514_v37 }
  0x2c   :  { %293 = vmatpush.bf16.msra.mxu3 %v522_v43  ;;  %374 = vmatpush.bf16.msra.mxu0 %v531_v3 }
  0x2d   :  { %280 = vmatpush.bf16.msra.mxu2 %v513_v39 }
  0x30   :  { %294 = vmatpush.bf16.msra.mxu3 %v521_v44  ;;  %375 = vmatpush.bf16.msra.mxu0 %v530_v4 }
  0x31   :  { %412 = vmatmul.msk.bf16.vlgmr.msrb.gmra.mxu1 %vm106_vm0, %v75_v32 }
  0x34   :  { %376 = vmatpush.bf16.msra.mxu0 %v529_v5 }
  0x9e   :  { %v119_v46 = vpop.f32.mrf.mxu1 }
  0x9f   :  { %v120_v48 = vadd.f32 %v119_v46, %v82_v47 }
  0xa1   :  { %v138_v51 = vmax.f32 %v120_v48, 0.0 }
  0xa6   :  { %v121_v49 = vpop.f32.mrf.mxu1 }
  0xa7   :  { %v122_v50 = vadd.f32 %v121_v49, %v82_v47 }
  0xa9   :  { %v140_v52 = vmax.f32 %v122_v50, 0.0 }
  0xab   :  { %v142_v53 = vpack.c.bf16 %v140_v52, %v138_v51 }
  0xad   :  { %281 = vmatmul.bf16.vlgmr.msra.gmra.mxu2 %v142_v53 }
  0xae   :  { %v133_v54 = vpop.f32.mrf.mxu1 }
  0xaf   :  { %v134_v56 = vadd.f32 %v133_v54, %v83_v55 }
  0xb1   :  { %v139_v59 = vmax.f32 %v134_v56, 0.0 }
  0xb6   :  { %v135_v57 = vpop.f32.mrf.mxu1 }
  0xb7   :  { %v136_v58 = vadd.f32 %v135_v57, %v83_v55 }
  0xb9   :  { %v141_v60 = vmax.f32 %v136_v58, 0.0 }
  0xbb   :  { %v143_v61 = vpack.c.bf16 %v141_v60, %v139_v59 }
  0xbd   :  { %295 = vmatmul.bf16.vlgmr.msra.gmra.mxu3 %v143_v61 }
 0x130   :  { %v282_v6 = vpop.f32.mrf.mxu2 }
 0x131   :  { %v283_v10 = vadd.f32 %v282_v6, %v176_v8 }
 0x138   :  { %v284_v9 = vpop.f32.mrf.mxu2 }
 0x139   :  { %v285_v11 = vadd.f32 %v284_v9, %v176_v8 }
 0x140   :  { %v296_v7 = vpop.f32.mrf.mxu3 }
 0x141   :  { %v297_v12 = vadd.f32 %v296_v7, %v283_v10 }
 0x143   :  { %v301_v15 = vmax.f32 %v297_v12, 0.0 }
 0x148   :  { %v298_v13 = vpop.f32.mrf.mxu3 }
 0x149   :  { %v299_v14 = vadd.f32 %v298_v13, %v285_v11 }
 0x14b   :  { %v302_v16 = vmax.f32 %v299_v14, 0.0 }
 0x14d   :  { %v303_v17 = vpack.c.bf16 %v302_v16, %v301_v15 }
 0x14f   :  { %377 = vmatmul.bf16.vlgmr.msra.gmra.mxu0 %v303_v17 }
 0x1cc   :  { %v378_v18 = vpop.f32.mrf.mxu0 }
 0x1cd   :  { %v379_v20 = vadd.f32 %v378_v18, %v320_v19 }
 0x1cf   :  { %552 = vtanh.f32 %v379_v20 }
 0x1d4   :  { %v380_v21 = vpop.f32.mrf.mxu0 }
 0x1d5   :  { %v381_v22 = vadd.f32 %v380_v21, %v320_v19  ;;  %v553_v23 = vpop.eup %552 }
 0x1d7   :  { %554 = vtanh.f32 %v381_v22 }
 0x1dd   :  { %v555_v24 = vpop.eup %554 }
 0x1de   :  { %v540_v25 = vpack.c.bf16 %v555_v24, %v553_v23 }
 0x1e0   :  { %541 = vst [vmem:[%s721_s7] sm:$0xff] %v540_v25  }
 0x1e1   :  { %393 = vsyncpa [#allocation3], 1 }
 0x1e2   :  { %394 = vsyncpa [#allocation5], 1 }

</bundles_post_ra>
